<compile_context>
chip_gen: v6e
topology: v6e:2x2x1
jax: 0.10.0
libtpu: 0.0.40
codegen_flags: <defaults>
</compile_context>

<pallas_src>
import functools

import jax
import jax.numpy as jnp
import numpy as np
from jax import lax
from jax.experimental import pallas as pl
from jax.experimental.pallas import tpu as pltpu

_LANE = 128
_SUBLANE = 8

# Fixed row offsets of the packed parameter slab ([_SLAB_ROWS, 128] f32):
#   rows [  0,128) : W1  conv1 weight, lane-padded                [128, hidden]
#   rows [128,256) : W2  conv2 weight, row/lane-padded            [hidden, out_gnn]
#   rows [256,384) : WH  gcn.lin folded into fc1_actor|fc1_critic [out_gnn, 2*mh]
#   rows [384,512) : WO  fc2_actor|fc2_critic block-diagonal      [2*mh, 128]
#   rows [512,520) : bias tile: row0=b1, row1=b2, row2=bh, row3=bo
_W1_ROW, _W2_ROW, _WH_ROW, _WO_ROW, _B_ROW = 0, 128, 256, 384, 512
_SLAB_ROWS = _B_ROW + _SUBLANE


def _round_up(v, m):
    return (v + m - 1) // m * m


def _gnn_policy_kernel(x_ref, a_ref, w_ref, out_ref, *, action_dim):
    x = x_ref[...]          # [Np, 128]  (batch dim squeezed by the BlockSpec)
    a_hat = a_ref[...]      # [Np, Np]

    def mxu(a, b):
        return jnp.dot(a, b, preferred_element_type=jnp.float32)

    # Static, 8-aligned views into the single packed parameter slab (one DMA total).
    w1 = w_ref[_W1_ROW:_W1_ROW + _LANE, :]
    w2 = w_ref[_W2_ROW:_W2_ROW + _LANE, :]
    wh = w_ref[_WH_ROW:_WH_ROW + _LANE, :]
    wo = w_ref[_WO_ROW:_WO_ROW + _LANE, :]
    biases = w_ref[_B_ROW:_B_ROW + _SUBLANE, :]          # [8, 128], one sublane tile
    b1, b2, bh, bo = (biases[0:1, :], biases[1:2, :],
                      biases[2:3, :], biases[3:4, :])

    # MXU operands stay f32: bf16 would cut vmatmul pushes but can exceed the
    # 1e-4 correctness tolerance of the test, so it is intentionally not used.
    # conv1: relu( A_hat @ (X W1) + b1 )   (zero lane-padding keeps pad lanes at 0)
    h = jnp.maximum(mxu(a_hat, mxu(x, w1)) + b1, 0.0)
    # conv2: relu( A_hat @ (H W2) + b2 )
    h = jnp.maximum(mxu(a_hat, mxu(h, w2)) + b2, 0.0)
    # gcn.lin was folded into WH/bh at build time, so the fused actor|critic fc1
    # consumes h directly.
    hid = jnp.maximum(mxu(h, wh) + bh, 0.0)              # [Np, 128]
    # fc2_actor | fc2_critic as one block-diagonal, lane-dense matmul:
    # logits in lanes [0, action_dim), critic value in lane action_dim, rest 0.
    raw = mxu(hid, wo) + bo                               # [Np, 128]

    lane = lax.broadcasted_iota(jnp.int32, raw.shape, dimension=1)
    is_logit = lane < action_dim
    m = jnp.max(jnp.where(is_logit, raw, -jnp.inf), axis=-1, keepdims=True)
    e = jnp.where(is_logit, jnp.exp(raw - m), 0.0)
    inv = pl.reciprocal(jnp.sum(e, axis=-1, keepdims=True), approx=False)
    soft = e * inv
    # single lane-dense store: softmax in logit lanes, raw critic value in lane action_dim
    out_ref[...] = jnp.where(lane == action_dim, raw, soft)


def _normalized_adjacency_np(edge_index, num_nodes):
    """Dense D^{-1/2}(A+I)D^{-1/2}, matching PyG GCNConv defaults (self-loops, sym norm).

    # TODO(synk): duplicate/parallel edges are deduplicated here; PyG's scatter-add
    # would count multiplicity. Identical for simple graphs like the test graph.
    """
    edge_index = np.asarray(edge_index)
    a = np.zeros((num_nodes, num_nodes), np.float32)
    a[edge_index[1], edge_index[0]] = 1.0
    np.fill_diagonal(a, 0.0)                     # add_remaining_self_loops semantics
    a = a + np.eye(num_nodes, dtype=np.float32)
    deg = a.sum(axis=1)
    dis = np.where(deg > 0, 1.0 / np.sqrt(deg), 0.0).astype(np.float32)
    return dis[:, None] * a * dis[None, :]


def build_gnn_policy(edge_index, params, action_dim, in_channels=128):
    """One-time setup: A_hat, packed+fused parameter slab, jitted single-pallas_call forward."""
    edge_index = np.asarray(edge_index)
    num_nodes = int(edge_index.max()) + 1                 # concrete, outside the hot path
    n_pad = _round_up(max(num_nodes, _SUBLANE), _SUBLANE)

    p = {k: np.asarray(v, np.float32) for k, v in params.items()}
    hidden = p["w1"].shape[1]
    out_gnn = p["w2"].shape[1]
    mlp_hidden = p["wa1"].shape[1]

    assert in_channels == _LANE, "GNNPolicy hardcodes 128-channel node features"
    assert hidden <= _LANE and out_gnn <= _LANE and 2 * mlp_hidden <= _LANE
    assert action_dim + 1 <= _LANE
    # TODO(synk): larger net_arch / action_dim / graphs would need a tiled grid
    # (A_hat blocked over destination nodes, vmem_limit_bytes set); not needed here.

    # --- hoisted glue: normalized adjacency (padded) ---
    a_hat_np = np.zeros((n_pad, n_pad), np.float32)
    a_hat_np[:num_nodes, :num_nodes] = _normalized_adjacency_np(edge_index, num_nodes)
    a_hat = jnp.asarray(a_hat_np)

    # --- hoisted glue: fuse heads, fold gcn.lin, pack everything into ONE slab ---
    wh = np.concatenate([p["wa1"], p["wc1"]], axis=1)          # [out_gnn, 2*mh]
    bh = np.concatenate([p["ba1"], p["bc1"]], axis=1)          # [1, 2*mh]
    wh_fused = p["wl"] @ wh                                    # fold lin weight
    bh_fused = p["bl"] @ wh + bh                               # fold lin bias

    slab = np.zeros((_SLAB_ROWS, _LANE), np.float32)
    slab[_W1_ROW:_W1_ROW + in_channels, :hidden] = p["w1"]
    slab[_W2_ROW:_W2_ROW + hidden, :out_gnn] = p["w2"]
    slab[_WH_ROW:_WH_ROW + out_gnn, :2 * mlp_hidden] = wh_fused
    slab[_WO_ROW:_WO_ROW + mlp_hidden, :action_dim] = p["wa2"]
    slab[_WO_ROW + mlp_hidden:_WO_ROW + 2 * mlp_hidden, action_dim] = p["wc2"][:, 0]
    slab[_B_ROW + 0, :hidden] = p["b1"][0]
    slab[_B_ROW + 1, :out_gnn] = p["b2"][0]
    slab[_B_ROW + 2, :2 * mlp_hidden] = bh_fused[0]
    slab[_B_ROW + 3, :action_dim] = p["ba2"][0]
    slab[_B_ROW + 3, action_dim] = p["bc2"][0, 0]
    w_slab = jnp.asarray(slab)

    kernel = functools.partial(_gnn_policy_kernel, action_dim=action_dim)
    call = pl.pallas_call(
        kernel,
        out_shape=jax.ShapeDtypeStruct((n_pad, _LANE), jnp.float32),
        grid_spec=pltpu.PrefetchScalarGridSpec(
            num_scalar_prefetch=0,
            grid=(1,),
            in_specs=[
                # obs sliced to the first n_pad graph rows directly by the BlockSpec
                # (no separate XLA pad / dynamic-update-slice on the hot path).
                pl.BlockSpec((None, n_pad, in_channels), lambda i: (0, 0, 0)),
                pl.BlockSpec((n_pad, n_pad), lambda i: (0, 0)),
                pl.BlockSpec((_SLAB_ROWS, _LANE), lambda i: (0, 0)),
            ],
            out_specs=pl.BlockSpec((n_pad, _LANE), lambda i: (0, 0)),
        ),
        compiler_params=pltpu.CompilerParams(
            dimension_semantics=("arbitrary",)),
    )

    @jax.jit
    def _forward(obs, a_hat_dev, w_slab_dev):
        obs = obs.astype(jnp.float32)
        if obs.shape[1] < n_pad:
            # Rare path: sublane-padded node count exceeds the observation rows.
            obs = jnp.pad(obs, ((0, 0), (0, n_pad - obs.shape[1]), (0, 0)))
        out = call(obs, a_hat_dev, w_slab_dev)                        # [n_pad, 128]
        head = lax.slice(out, (0, 0), (num_nodes, action_dim + 1))    # one post-kernel slice
        return head[:, :action_dim], head[:, action_dim]

    return lambda obs: _forward(obs, a_hat, w_slab)


def _reference_forward(obs, edge_index, params, action_dim):
    num_nodes = int(np.asarray(edge_index).max()) + 1
    x = obs[0, :num_nodes, :].astype(jnp.float32)
    a_hat = jnp.asarray(_normalized_adjacency_np(edge_index, num_nodes))
    h = jnp.maximum(a_hat @ (x @ params["w1"]) + params["b1"], 0.0)
    h = jnp.maximum(a_hat @ (h @ params["w2"]) + params["b2"], 0.0)
    feats = h @ params["wl"] + params["bl"]
    a1 = jnp.maximum(feats @ params["wa1"] + params["ba1"], 0.0)
    act = jax.nn.softmax(a1 @ params["wa2"] + params["ba2"], axis=-1)
    c1 = jnp.maximum(feats @ params["wc1"] + params["bc1"], 0.0)
    val = (c1 @ params["wc2"] + params["bc2"])[:, 0]
    return act, val


def init_params(key, in_channels, net_arch, action_dim):
    # net_arch = [hidden_channels, mlp_hidden, out_channels_gnn]; out_channels_gnn must
    # equal 2 for the original module's forward to be shape-consistent (GCNNetwork.lin -> 2).
    hidden, mlp_hidden, out_gnn = net_arch[0], net_arch[1], net_arch[-1]
    shapes = {
        "w1": (in_channels, hidden), "b1": (1, hidden),
        "w2": (hidden, out_gnn),     "b2": (1, out_gnn),
        "wl": (out_gnn, 2),          "bl": (1, 2),
        "wa1": (out_gnn, mlp_hidden), "ba1": (1, mlp_hidden),
        "wa2": (mlp_hidden, action_dim), "ba2": (1, action_dim),
        "wc1": (out_gnn, mlp_hidden), "bc1": (1, mlp_hidden),
        "wc2": (mlp_hidden, 1),       "bc2": (1, 1),
    }
    keys = jax.random.split(key, len(shapes))
    return {name: (0.1 * jax.random.normal(k, shp, jnp.float32))
            for (name, shp), k in zip(shapes.items(), keys)}


if __name__ == "__main__":
    key = jax.random.PRNGKey(0)
    k_obs, k_par = jax.random.split(key)

    in_channels = 128                 # hardcoded in GNNPolicy.__init__
    net_arch = [32, 32, 2]            # [hidden_channels, mlp_hidden, out_channels_gnn]
    action_dim = 4
    num_graph_nodes = 8
    obs_nodes = 12                    # observation has more rows than the graph uses

    # obs: [batch=1, obs_nodes, 128]
    obs = jax.random.normal(k_obs, (1, obs_nodes, in_channels), jnp.float32)

    # directed ring graph (both directions) on 8 nodes; edge_index.max()+1 == 8
    src = np.arange(num_graph_nodes)
    dst = (src + 1) % num_graph_nodes
    edge_index = np.stack([np.concatenate([src, dst]),
                           np.concatenate([dst, src])]).astype(np.int32)

    params = init_params(k_par, in_channels, net_arch, action_dim)

    forward = build_gnn_policy(edge_index, params, action_dim, in_channels)
    action_means, state_values = forward(obs)
    jax.block_until_ready((action_means, state_values))

    ref_act, ref_val = _reference_forward(obs, edge_index, params, action_dim)
    np.testing.assert_allclose(np.asarray(action_means), np.asarray(ref_act),
                               rtol=1e-4, atol=1e-4)
    np.testing.assert_allclose(np.asarray(state_values), np.asarray(ref_val),
                               rtol=1e-4, atol=1e-4)
    assert action_means.shape == (num_graph_nodes, action_dim)
    assert state_values.shape == (num_graph_nodes,)

    print("KERNEL_OK")
</pallas_src>

<mosaic_0001>
module attributes {stable_mosaic.version = 11 : i64} {
  func.func @_gnn_policy_kernel(%arg0: i32, %arg1: memref<1x8x128xf32, #tpu.memory_space<vmem>>, %arg2: memref<8x8xf32, #tpu.memory_space<vmem>>, %arg3: memref<520x128xf32, #tpu.memory_space<vmem>>, %arg4: memref<8x128xf32, #tpu.memory_space<vmem>>) attributes {dimension_semantics = [#tpu.dimension_semantics<arbitrary>], iteration_bounds = array<i64: 1>, scalar_prefetch = 0 : i64, scratch_operands = 0 : i64, tpu.core_type = #tpu.core_type<tc>, window_params = [{transform_indices = @transform_0, window_bounds = array<i64: 1, 8, 128>}, {pipeline_mode = #tpu.pipeline_mode<synchronous>, transform_indices = @transform_1, window_bounds = array<i64: 8, 8>}, {pipeline_mode = #tpu.pipeline_mode<synchronous>, transform_indices = @transform_2, window_bounds = array<i64: 520, 128>}, {pipeline_mode = #tpu.pipeline_mode<synchronous>, transform_indices = @transform_3, window_bounds = array<i64: 8, 128>}]} {
    %c0 = arith.constant 0 : index
    %c0_0 = arith.constant 0 : index
    %c0_1 = arith.constant 0 : index
    %0 = vector.load %arg1[%c0, %c0_0, %c0_1] : memref<1x8x128xf32, #tpu.memory_space<vmem>>, vector<1x8x128xf32>
    %1 = vector.shape_cast %0 : vector<1x8x128xf32> to vector<8x128xf32>
    %c0_2 = arith.constant 0 : index
    %c0_3 = arith.constant 0 : index
    %2 = vector.load %arg2[%c0_2, %c0_3] : memref<8x8xf32, #tpu.memory_space<vmem>>, vector<8x8xf32>
    %c0_4 = arith.constant 0 : index
    %c0_5 = arith.constant 0 : index
    %3 = vector.load %arg3[%c0_4, %c0_5] : memref<520x128xf32, #tpu.memory_space<vmem>>, vector<128x128xf32>
    %c128 = arith.constant 128 : index
    %c0_6 = arith.constant 0 : index
    %4 = vector.load %arg3[%c128, %c0_6] : memref<520x128xf32, #tpu.memory_space<vmem>>, vector<128x128xf32>
    %c256 = arith.constant 256 : index
    %c0_7 = arith.constant 0 : index
    %5 = vector.load %arg3[%c256, %c0_7] : memref<520x128xf32, #tpu.memory_space<vmem>>, vector<128x128xf32>
    %c384 = arith.constant 384 : index
    %c0_8 = arith.constant 0 : index
    %6 = vector.load %arg3[%c384, %c0_8] : memref<520x128xf32, #tpu.memory_space<vmem>>, vector<128x128xf32>
    %c512 = arith.constant 512 : index
    %c0_9 = arith.constant 0 : index
    %7 = vector.load %arg3[%c512, %c0_9] : memref<520x128xf32, #tpu.memory_space<vmem>>, vector<8x128xf32>
    %8 = vector.extract_strided_slice %7 {offsets = [0, 0], sizes = [1, 128], strides = [1, 1]} : vector<8x128xf32> to vector<1x128xf32>
    %9 = vector.extract_strided_slice %7 {offsets = [1, 0], sizes = [1, 128], strides = [1, 1]} : vector<8x128xf32> to vector<1x128xf32>
    %10 = vector.extract_strided_slice %7 {offsets = [2, 0], sizes = [1, 128], strides = [1, 1]} : vector<8x128xf32> to vector<1x128xf32>
    %11 = vector.extract_strided_slice %7 {offsets = [3, 0], sizes = [1, 128], strides = [1, 1]} : vector<8x128xf32> to vector<1x128xf32>
    %cst = arith.constant dense<0.000000e+00> : vector<8x128xf32>
    %12 = tpu.matmul %1, %3, %cst {dimension_numbers = #tpu.dot_dimension_numbers<[1], [0], [0], [1], [0, 0, 1, 1], [], []>} : vector<8x128xf32>, vector<128x128xf32>, vector<8x128xf32> -> vector<8x128xf32>
    %cst_10 = arith.constant dense<0.000000e+00> : vector<8x128xf32>
    %13 = tpu.matmul %2, %12, %cst_10 {dimension_numbers = #tpu.dot_dimension_numbers<[1], [0], [0], [1], [0, 0, 1, 1], [], []>} : vector<8x8xf32>, vector<8x128xf32>, vector<8x128xf32> -> vector<8x128xf32>
    %14 = vector.broadcast %8 : vector<1x128xf32> to vector<8x128xf32>
    %15 = arith.addf %13, %14 : vector<8x128xf32>
    %cst_11 = arith.constant 0.000000e+00 : f32
    %16 = vector.broadcast %cst_11 : f32 to vector<8x128xf32>
    %17 = arith.maximumf %15, %16 : vector<8x128xf32>
    %cst_12 = arith.constant dense<0.000000e+00> : vector<8x128xf32>
    %18 = tpu.matmul %17, %4, %cst_12 {dimension_numbers = #tpu.dot_dimension_numbers<[1], [0], [0], [1], [0, 0, 1, 1], [], []>} : vector<8x128xf32>, vector<128x128xf32>, vector<8x128xf32> -> vector<8x128xf32>
    %cst_13 = arith.constant dense<0.000000e+00> : vector<8x128xf32>
    %19 = tpu.matmul %2, %18, %cst_13 {dimension_numbers = #tpu.dot_dimension_numbers<[1], [0], [0], [1], [0, 0, 1, 1], [], []>} : vector<8x8xf32>, vector<8x128xf32>, vector<8x128xf32> -> vector<8x128xf32>
    %20 = vector.broadcast %9 : vector<1x128xf32> to vector<8x128xf32>
    %21 = arith.addf %19, %20 : vector<8x128xf32>
    %cst_14 = arith.constant 0.000000e+00 : f32
    %22 = vector.broadcast %cst_14 : f32 to vector<8x128xf32>
    %23 = arith.maximumf %21, %22 : vector<8x128xf32>
    %cst_15 = arith.constant dense<0.000000e+00> : vector<8x128xf32>
    %24 = tpu.matmul %23, %5, %cst_15 {dimension_numbers = #tpu.dot_dimension_numbers<[1], [0], [0], [1], [0, 0, 1, 1], [], []>} : vector<8x128xf32>, vector<128x128xf32>, vector<8x128xf32> -> vector<8x128xf32>
    %25 = vector.broadcast %10 : vector<1x128xf32> to vector<8x128xf32>
    %26 = arith.addf %24, %25 : vector<8x128xf32>
    %cst_16 = arith.constant 0.000000e+00 : f32
    %27 = vector.broadcast %cst_16 : f32 to vector<8x128xf32>
    %28 = arith.maximumf %26, %27 : vector<8x128xf32>
    %cst_17 = arith.constant dense<0.000000e+00> : vector<8x128xf32>
    %29 = tpu.matmul %28, %6, %cst_17 {dimension_numbers = #tpu.dot_dimension_numbers<[1], [0], [0], [1], [0, 0, 1, 1], [], []>} : vector<8x128xf32>, vector<128x128xf32>, vector<8x128xf32> -> vector<8x128xf32>
    %30 = vector.broadcast %11 : vector<1x128xf32> to vector<8x128xf32>
    %31 = arith.addf %29, %30 : vector<8x128xf32>
    %32 = tpu.iota {dimensions = array<i32: 1>} : vector<8x128xi32>
    %c4_i32 = arith.constant 4 : i32
    %33 = vector.broadcast %c4_i32 : i32 to vector<8x128xi32>
    %34 = arith.cmpi slt, %32, %33 : vector<8x128xi32>
    %cst_18 = arith.constant 0xFF800000 : f32
    %35 = vector.broadcast %cst_18 : f32 to vector<8x128xf32>
    %36 = arith.select %34, %31, %35 : vector<8x128xi1>, vector<8x128xf32>
    %cst_19 = arith.constant dense<0xFF800000> : vector<8xf32>
    %37 = vector.multi_reduction <maximumf>, %36, %cst_19 [1] : vector<8x128xf32> to vector<8xf32>
    %38 = vector.shape_cast %37 : vector<8xf32> to vector<8x1xf32>
    %39 = vector.broadcast %38 : vector<8x1xf32> to vector<8x128xf32>
    %40 = arith.subf %31, %39 : vector<8x128xf32>
    %41 = math.exp %40 : vector<8x128xf32>
    %cst_20 = arith.constant 0.000000e+00 : f32
    %42 = vector.broadcast %cst_20 : f32 to vector<8x128xf32>
    %43 = arith.select %34, %41, %42 : vector<8x128xi1>, vector<8x128xf32>
    %cst_21 = arith.constant dense<0.000000e+00> : vector<8xf32>
    %44 = vector.multi_reduction <add>, %43, %cst_21 [1] : vector<8x128xf32> to vector<8xf32>
    %45 = vector.shape_cast %44 : vector<8xf32> to vector<8x1xf32>
    %46 = tpu.reciprocal %45 : vector<8x1xf32> -> vector<8x1xf32>
    %47 = vector.broadcast %46 : vector<8x1xf32> to vector<8x128xf32>
    %48 = arith.mulf %43, %47 : vector<8x128xf32>
    %c4_i32_22 = arith.constant 4 : i32
    %49 = vector.broadcast %c4_i32_22 : i32 to vector<8x128xi32>
    %50 = arith.cmpi eq, %32, %49 : vector<8x128xi32>
    %51 = arith.select %50, %31, %48 : vector<8x128xi1>, vector<8x128xf32>
    %c0_23 = arith.constant 0 : index
    %c0_24 = arith.constant 0 : index
    %52 = vector.load %arg4[%c0_23, %c0_24] : memref<8x128xf32, #tpu.memory_space<vmem>>, vector<8x128xf32>
    tpu.vector_store %arg4[%c0_23, %c0_24], %51 {strides = array<i32>} : memref<8x128xf32, #tpu.memory_space<vmem>>, vector<8x128xf32>,
    return
  }
  func.func @transform_0(%arg0: i32) -> (i32, i32, i32) {
    %c0_i32 = arith.constant 0 : i32
    %c0_i32_0 = arith.constant 0 : i32
    %c0_i32_1 = arith.constant 0 : i32
    %c0_i32_2 = arith.constant 0 : i32
    return %c0_i32, %c0_i32_0, %c0_i32_1 : i32, i32, i32
  }
  func.func @transform_1(%arg0: i32) -> (i32, i32) {
    %c0_i32 = arith.constant 0 : i32
    %c0_i32_0 = arith.constant 0 : i32
    %c0_i32_1 = arith.constant 0 : i32
    return %c0_i32, %c0_i32_0 : i32, i32
  }
  func.func @transform_2(%arg0: i32) -> (i32, i32) {
    %c0_i32 = arith.constant 0 : i32
    %c0_i32_0 = arith.constant 0 : i32
    %c0_i32_1 = arith.constant 0 : i32
    return %c0_i32, %c0_i32_0 : i32, i32
  }
  func.func @transform_3(%arg0: i32) -> (i32, i32) {
    %c0_i32 = arith.constant 0 : i32
    %c0_i32_0 = arith.constant 0 : i32
    %c0_i32_1 = arith.constant 0 : i32
    return %c0_i32, %c0_i32_0 : i32, i32
  }
}

</mosaic_0001>

<bundles_post_ra>
// kernel: _forward.1
= control target key start
LH: loop header
LB: loop body
LE: loop exit
PB: predicated region body
PF: predicated region fallthrough
CT: control target
= control target key end

     0   :  { %8 = vsyncpa [#allocation3], 0  ;;  %s815_s12 = smov [#allocation2]   ;;  %s950_s0 = inlined_call_operand.vmem [shape: f32[1,12,128], index: 0, kind: input, shape index: {}]   ;;  %s951_s1 = inlined_call_operand.vmem [shape: f32[8,8], index: 1, kind: input, shape index: {}]   ;;  %s952_s2 = inlined_call_operand.hbm [shape: f32[520,128], index: 2, kind: input, shape index: {}]   ;;  %s953_s3 = inlined_call_operand.vmem [shape: f32[8,128], index: 3, kind: output, shape index: {}]  }
   0x1   :  { %s18_s13 = sshll.u32 %s815_s12, 4  ;;  %s19_s13 = int_to_ptr.vmem [resolvable:$true] %s18_s13 }
   0x2   :  { %s801_s14 = scalar_lea.vmem %s19_s13, 8320  ;;  %p806_p1 = scmp.lt.s32.totalorder %s19_s13, %s19_s13 }
   0x3   :  { %p802_p0 = scmp.ne.s32.totalorder %s19_s13, %s801_s14  ;;  %p807_p2 = scmp.lt.s32.totalorder %s801_s14, %s801_s14 }
   0x5   :  { %p808_p3 = por %p807_p2, %p806_p1 }
   0x7   :  { %p809_p4 = pnand %p808_p3, %p802_p0 }
   0x9   :  { %812 = shalt.err (!%p809_p4)
}
   0xa   :  { %s816_s15 = smov 128   ;;  %s817_s16 = smov 8  }
   0xb   :  { %24 = dma.hbm_to_vmem [thread:$0]  %s952_s2, 8320, %s19_s13, [#allocation3], %s816_s15, %s816_s15, %s817_s16  }
   0xc   :  { %813 = dma.done.wait [#allocation3], 8320  }
   0xd   :  { %814 = vsyncadd [#allocation3], 4294958976  ;;  %v818_v0 = vmov 0.0   ;;  %vm819_vm0 = vmmov 0   ;;  %v45_v1 = vld [vmem:[#allocation2 + $0x78] sm:$0xff]  ;;  %v44_v2 = vld [vmem:[#allocation2 + $0x70] sm:$0xff]  ;;  %v165_v37 = vlaneseq }
   0xe   :  { %634 = vmatprep.subr.mxu0 %v818_v0  ;;  %666 = vmatprep.mubr.msk.f32.mxu0 %vm819_vm0, %v818_v0  ;;  %v43_v3 = vld [vmem:[#allocation2 + $0x68] sm:$0xff]  ;;  %v42_v4 = vld [vmem:[#allocation2 + $0x60] sm:$0xff]  ;;  %v41_v5 = vld [vmem:[#allocation2 + $0x58] sm:$0xff]  ;;  %vm169_vm1 = vcmask 64512  }
   0xf   :  { %669 = vmatprep.subr.mxu1 %v818_v0  ;;  %671 = vmatprep.mubr.msk.f32.mxu1 %vm819_vm0, %v818_v0  ;;  %v40_v6 = vld [vmem:[#allocation2 + $0x50] sm:$0xff]  ;;  %v39_v7 = vld [vmem:[#allocation2 + $0x48] sm:$0xff]  ;;  %v38_v8 = vld [vmem:[#allocation2 + $0x40] sm:$0xff]  ;;  %v897_v38 = vshrl.u32 %v165_v37, 7 }
  0x10   :  { %635 = vmatpush3.msra.mxu0 %v45_v1  ;;  %v37_v9 = vld [vmem:[#allocation2 + $0x38] sm:$0xff]  ;;  %v36_v10 = vld [vmem:[#allocation2 + $0x30] sm:$0xff]  ;;  %v35_v11 = vld [vmem:[#allocation2 + $0x28] sm:$0xff] }
  0x11   :  { %636 = vmatprep.subr.mxu0 %v818_v0  ;;  %v34_v12 = vld [vmem:[#allocation2 + $0x20] sm:$0xff]  ;;  %v33_v13 = vld [vmem:[#allocation2 + $0x18] sm:$0xff]  ;;  %v32_v14 = vld [vmem:[#allocation2 + $0x10] sm:$0xff]  ;;  %v167_v39 = vsub.s32 0, %v897_v38 }
  0x12   :  { %637 = vmatpush3.msra.mxu0 %v44_v2  ;;  %v31_v15 = vld [vmem:[#allocation2 + $0x8] sm:$0xff]  ;;  %v30_v16 = vld [vmem:[#allocation2] sm:$0xff]  ;;  %v61_v20 = vld [vmem:[#allocation2 + $0xf8] sm:$0xff] }
  0x13   :  { %638 = vmatprep.subr.mxu0 %v818_v0  ;;  %v28_v17 = vld [vmem:[%s950_s0] sm:$0xff]  ;;  %v60_v22 = vld [vmem:[#allocation2 + $0xf0] sm:$0xff]  ;;  %v59_v23 = vld [vmem:[#allocation2 + $0xe8] sm:$0xff] }
  0x14   :  { %639 = vmatpush3.msra.mxu0 %v43_v3  ;;  %v873_v18 = vld [vmem:[%s951_s1] sm:$0xff]  ;;  %v57_v25 = vld [vmem:[#allocation2 + $0xd8] sm:$0xff]  ;;  %v56_v26 = vld [vmem:[#allocation2 + $0xd0] sm:$0xff] }
  0x15   :  { %640 = vmatprep.subr.mxu0 %v818_v0  ;;  %v58_v24 = vld [vmem:[#allocation2 + $0xe0] sm:$0xff]  ;;  %v55_v27 = vld [vmem:[#allocation2 + $0xc8] sm:$0xff]  ;;  %v53_v29 = vld [vmem:[#allocation2 + $0xb8] sm:$0xff] }
  0x16   :  { %641 = vmatpush3.msra.mxu0 %v42_v4  ;;  %v54_v28 = vld [vmem:[#allocation2 + $0xc0] sm:$0xff]  ;;  %v52_v30 = vld [vmem:[#allocation2 + $0xb0] sm:$0xff]  ;;  %v51_v31 = vld [vmem:[#allocation2 + $0xa8] sm:$0xff] }
  0x17   :  { %642 = vmatprep.subr.mxu0 %v818_v0  ;;  %v50_v32 = vld [vmem:[#allocation2 + $0xa0] sm:$0xff]  ;;  %v49_v33 = vld [vmem:[#allocation2 + $0x98] sm:$0xff]  ;;  %v48_v34 = vld [vmem:[#allocation2 + $0x90] sm:$0xff] }
  0x18   :  { %643 = vmatpush3.msra.mxu0 %v41_v5  ;;  %v47_v35 = vld [vmem:[#allocation2 + $0x88] sm:$0xff]  ;;  %v46_v36 = vld [vmem:[#allocation2 + $0x80] sm:$0xff]  ;;  %v77_v46 = vld [vmem:[#allocation2 + $0x178] sm:$0xff] }
  0x19   :  { %644 = vmatprep.subr.mxu0 %v818_v0  ;;  %v900_v40 = vld [vmem:[#allocation2 + $0x200] sm:$0xff]  ;;  %v76_v47 = vld [vmem:[#allocation2 + $0x170] sm:$0xff]  ;;  %v75_v48 = vld [vmem:[#allocation2 + $0x168] sm:$0xff] }
  0x1a   :  { %645 = vmatpush3.msra.mxu0 %v40_v6  ;;  %v168_v41 = vrot.slane %v900_v40, %v167_v39  ;;  %v74_v49 = vld [vmem:[#allocation2 + $0x160] sm:$0xff]  ;;  %v73_v50 = vld [vmem:[#allocation2 + $0x158] sm:$0xff]  ;;  %v72_v51 = vld [vmem:[#allocation2 + $0x150] sm:$0xff] }
  0x1b   :  { %646 = vmatprep.subr.mxu0 %v818_v0  ;;  %v71_v52 = vld [vmem:[#allocation2 + $0x148] sm:$0xff]  ;;  %v70_v53 = vld [vmem:[#allocation2 + $0x140] sm:$0xff]  ;;  %v69_v54 = vld [vmem:[#allocation2 + $0x138] sm:$0xff] }
  0x1c   :  { %647 = vmatpush3.msra.mxu0 %v39_v7  ;;  %v68_v55 = vld [vmem:[#allocation2 + $0x130] sm:$0xff]  ;;  %v67_v56 = vld [vmem:[#allocation2 + $0x128] sm:$0xff]  ;;  %v66_v57 = vld [vmem:[#allocation2 + $0x120] sm:$0xff] }
  0x1d   :  { %648 = vmatprep.subr.mxu0 %v818_v0  ;;  %v65_v58 = vld [vmem:[#allocation2 + $0x118] sm:$0xff]  ;;  %v64_v61 = vld [vmem:[#allocation2 + $0x110] sm:$0xff]  ;;  %v63_v62 = vld [vmem:[#allocation2 + $0x108] sm:$0xff] }
  0x1e   :  { %649 = vmatpush3.msra.mxu0 %v38_v8  ;;  %v62_v63 = vld [vmem:[#allocation2 + $0x100] sm:$0xff]  ;;  %v93_v1 = vld [vmem:[#allocation2 + $0x1f8] sm:$0xff]  ;;  %v92_v2 = vld [vmem:[#allocation2 + $0x1f0] sm:$0xff] }
  0x1f   :  { %650 = vmatprep.subr.mxu0 %v818_v0  ;;  %v91_v3 = vld [vmem:[#allocation2 + $0x1e8] sm:$0xff]  ;;  %v90_v4 = vld [vmem:[#allocation2 + $0x1e0] sm:$0xff]  ;;  %v89_v5 = vld [vmem:[#allocation2 + $0x1d8] sm:$0xff] }
  0x20   :  { %651 = vmatpush3.msra.mxu0 %v37_v9  ;;  %v88_v6 = vld [vmem:[#allocation2 + $0x1d0] sm:$0xff]  ;;  %v87_v7 = vld [vmem:[#allocation2 + $0x1c8] sm:$0xff]  ;;  %v86_v8 = vld [vmem:[#allocation2 + $0x1c0] sm:$0xff] }
  0x21   :  { %652 = vmatprep.subr.mxu0 %v818_v0  ;;  %v85_v9 = vld [vmem:[#allocation2 + $0x1b8] sm:$0xff] }
  0x22   :  { %653 = vmatpush3.msra.mxu0 %v36_v10  ;;  %v84_v10 = vld [vmem:[#allocation2 + $0x1b0] sm:$0xff] }
  0x23   :  { %654 = vmatprep.subr.mxu0 %v818_v0 }
  0x24   :  { %655 = vmatpush3.msra.mxu0 %v35_v11  ;;  %v83_v11 = vld [vmem:[#allocation2 + $0x1a8] sm:$0xff] }
  0x25   :  { %656 = vmatprep.subr.mxu0 %v818_v0 }
  0x26   :  { %657 = vmatpush3.msra.mxu0 %v34_v12  ;;  %v82_v12 = vld [vmem:[#allocation2 + $0x1a0] sm:$0xff] }
  0x27   :  { %658 = vmatprep.subr.mxu0 %v818_v0 }
  0x28   :  { %659 = vmatpush3.msra.mxu0 %v33_v13  ;;  %v81_v13 = vld [vmem:[#allocation2 + $0x198] sm:$0xff] }
  0x29   :  { %660 = vmatprep.subr.mxu0 %v818_v0 }
  0x2a   :  { %661 = vmatpush3.msra.mxu0 %v32_v14  ;;  %v316_v14 = vsub.s32 1, %v897_v38 }
  0x2b   :  { %662 = vmatprep.subr.mxu0 %v818_v0 }
  0x2c   :  { %663 = vmatpush3.msra.mxu0 %v31_v15  ;;  %v317_v15 = vrot.slane %v900_v40, %v316_v14 }
  0x2d   :  { %664 = vmatprep.subr.mxu0 %v818_v0 }
  0x2e   :  { %665 = vmatpush3.msra.mxu0 %v30_v16 }
  0x2f   :  { %667 = vmatmul.mubr.f32.vlgmr.msra.gmra.mxu0 %v28_v17  ;;  %709 = vmatprep.subr.mxu0 %v818_v0 }
  0x30   :  { %711 = vmatprep.mubr.msk.f32.mxu0 %vm819_vm0, %v818_v0 }
  0xef   :  { %v161_v19 = vpop.f32.mrf.mxu0 }
  0xf0   :  { %670 = vmatpush3.msra.mxu1 %v161_v19 }
  0xf1   :  { %v668_v21 = vpop.f32.mrf.mxu0  ;;  %672 = vmatmul.mubr.msk.f32.vlgmr.msra.gmra.mxu1 %vm169_vm1, %v873_v18  ;;  %674 = vmatprep.subr.mxu1 %v818_v0 }
  0xf2   :  { %675 = vmatpush3.msra.mxu1 %v61_v20  ;;  %706 = vmatprep.mubr.msk.f32.mxu1 %vm819_vm0, %v818_v0  ;;  %v80_v20 = vld [vmem:[#allocation2 + $0x190] sm:$0xff]  ;;  %v79_v21 = vld [vmem:[#allocation2 + $0x188] sm:$0xff] }
  0xf3   :  { %676 = vmatprep.subr.mxu1 %v818_v0 }
  0xf4   :  { %677 = vmatpush3.msra.mxu1 %v60_v22  ;;  %v78_v22 = vld [vmem:[#allocation2 + $0x180] sm:$0xff] }
  0xf5   :  { %678 = vmatprep.subr.mxu1 %v818_v0 }
  0xf6   :  { %679 = vmatpush3.msra.mxu1 %v59_v23  ;;  %v391_v23 = vsub.s32 2, %v897_v38 }
  0xf7   :  { %680 = vmatprep.subr.mxu1 %v818_v0 }
  0xf8   :  { %681 = vmatpush3.msra.mxu1 %v58_v24  ;;  %v392_v24 = vrot.slane %v900_v40, %v391_v23 }
  0xf9   :  { %682 = vmatprep.subr.mxu1 %v818_v0 }
  0xfa   :  { %683 = vmatpush3.msra.mxu1 %v57_v25 }
  0xfb   :  { %684 = vmatprep.subr.mxu1 %v818_v0 }
  0xfc   :  { %685 = vmatpush3.msra.mxu1 %v56_v26 }
  0xfd   :  { %686 = vmatprep.subr.mxu1 %v818_v0 }
  0xfe   :  { %687 = vmatpush3.msra.mxu1 %v55_v27 }
  0xff   :  { %688 = vmatprep.subr.mxu1 %v818_v0 }
 0x100   :  { %689 = vmatpush3.msra.mxu1 %v54_v28 }
 0x101   :  { %690 = vmatprep.subr.mxu1 %v818_v0 }
 0x102   :  { %691 = vmatpush3.msra.mxu1 %v53_v29  ;;  %v466_v29 = vsub.s32 3, %v897_v38 }
 0x103   :  { %692 = vmatprep.subr.mxu1 %v818_v0 }
 0x104   :  { %693 = vmatpush3.msra.mxu1 %v52_v30  ;;  %v539_v30 = vand.u32 127, %v165_v37 }
 0x105   :  { %694 = vmatprep.subr.mxu1 %v818_v0 }
 0x106   :  { %695 = vmatpush3.msra.mxu1 %v51_v31  ;;  %v467_v31 = vrot.slane %v900_v40, %v466_v29  ;;  %vm540_vm2 = vcmp.lt.s32.totalorder %v539_v30, 4  ;;  %vm552_vm3 = vcmp.eq.s32.totalorder %v539_v30, 4 }
 0x107   :  { %696 = vmatprep.subr.mxu1 %v818_v0 }
 0x108   :  { %697 = vmatpush3.msra.mxu1 %v50_v32 }
 0x109   :  { %698 = vmatprep.subr.mxu1 %v818_v0 }
 0x10a   :  { %699 = vmatpush3.msra.mxu1 %v49_v33 }
 0x10b   :  { %700 = vmatprep.subr.mxu1 %v818_v0 }
 0x10c   :  { %701 = vmatpush3.msra.mxu1 %v48_v34 }
 0x10d   :  { %702 = vmatprep.subr.mxu1 %v818_v0 }
 0x10e   :  { %703 = vmatpush3.msra.mxu1 %v47_v35 }
 0x10f   :  { %704 = vmatprep.subr.mxu1 %v818_v0 }
 0x110   :  { %705 = vmatpush3.msra.mxu1 %v46_v36 }
 0x111   :  { %714 = vmatprep.subr.mxu1 %v818_v0 }
 0x1b1   :  { %v239_v42 = vpop.f32.mrf.mxu1 }
 0x1b2   :  { %v240_v43 = vadd.f32 %v239_v42, %v168_v41 }
 0x1b3   :  { %v673_v44 = vpop.f32.mrf.mxu1 }
 0x1b4   :  { %v243_v45 = vmax.f32 %v240_v43, 0.0 }
 0x1b6   :  { %707 = vmatmul.mubr.f32.vlgmr.msra.gmra.mxu1 %v243_v45 }
 0x1b7   :  { %746 = vmatprep.mubr.msk.f32.mxu1 %vm819_vm0, %v818_v0  ;;  %715 = vmatpush3.msra.mxu1 %v77_v46 }
 0x1b8   :  { %716 = vmatprep.subr.mxu1 %v818_v0 }
 0x1b9   :  { %717 = vmatpush3.msra.mxu1 %v76_v47 }
 0x1ba   :  { %718 = vmatprep.subr.mxu1 %v818_v0 }
 0x1bb   :  { %719 = vmatpush3.msra.mxu1 %v75_v48 }
 0x1bc   :  { %720 = vmatprep.subr.mxu1 %v818_v0 }
 0x1bd   :  { %721 = vmatpush3.msra.mxu1 %v74_v49 }
 0x1be   :  { %722 = vmatprep.subr.mxu1 %v818_v0 }
 0x1bf   :  { %723 = vmatpush3.msra.mxu1 %v73_v50 }
 0x1c0   :  { %724 = vmatprep.subr.mxu1 %v818_v0 }
 0x1c1   :  { %725 = vmatpush3.msra.mxu1 %v72_v51 }
 0x1c2   :  { %726 = vmatprep.subr.mxu1 %v818_v0 }
 0x1c3   :  { %727 = vmatpush3.msra.mxu1 %v71_v52 }
 0x1c4   :  { %728 = vmatprep.subr.mxu1 %v818_v0 }
 0x1c5   :  { %729 = vmatpush3.msra.mxu1 %v70_v53 }
 0x1c6   :  { %730 = vmatprep.subr.mxu1 %v818_v0 }
 0x1c7   :  { %731 = vmatpush3.msra.mxu1 %v69_v54 }
 0x1c8   :  { %732 = vmatprep.subr.mxu1 %v818_v0 }
 0x1c9   :  { %733 = vmatpush3.msra.mxu1 %v68_v55 }
 0x1ca   :  { %734 = vmatprep.subr.mxu1 %v818_v0 }
 0x1cb   :  { %735 = vmatpush3.msra.mxu1 %v67_v56 }
 0x1cc   :  { %736 = vmatprep.subr.mxu1 %v818_v0 }
 0x1cd   :  { %737 = vmatpush3.msra.mxu1 %v66_v57 }
 0x1ce   :  { %738 = vmatprep.subr.mxu1 %v818_v0 }
 0x1cf   :  { %739 = vmatpush3.msra.mxu1 %v65_v58 }
 0x1d0   :  { %740 = vmatprep.subr.mxu1 %v818_v0 }
 0x1d1   :  { %741 = vmatpush3.msra.mxu1 %v64_v61 }
 0x1d2   :  { %742 = vmatprep.subr.mxu1 %v818_v0 }
 0x1d3   :  { %743 = vmatpush3.msra.mxu1 %v63_v62 }
 0x1d4   :  { %744 = vmatprep.subr.mxu1 %v818_v0 }
 0x1d5   :  { %745 = vmatpush3.msra.mxu1 %v62_v63 }
 0x276   :  { %v310_v59 = vpop.f32.mrf.mxu1 }
 0x277   :  { %710 = vmatpush3.msra.mxu0 %v310_v59 }
 0x278   :  { %v708_v60 = vpop.f32.mrf.mxu1  ;;  %712 = vmatmul.mubr.msk.f32.vlgmr.msra.gmra.mxu0 %vm169_vm1, %v873_v18  ;;  %749 = vmatprep.subr.mxu0 %v818_v0 }
 0x279   :  { %781 = vmatprep.mubr.msk.f32.mxu0 %vm819_vm0, %v818_v0  ;;  %750 = vmatpush3.msra.mxu0 %v93_v1 }
 0x27a   :  { %751 = vmatprep.subr.mxu0 %v818_v0 }
 0x27b   :  { %752 = vmatpush3.msra.mxu0 %v92_v2 }
 0x27c   :  { %753 = vmatprep.subr.mxu0 %v818_v0 }
 0x27d   :  { %754 = vmatpush3.msra.mxu0 %v91_v3 }
 0x27e   :  { %755 = vmatprep.subr.mxu0 %v818_v0 }
 0x27f   :  { %756 = vmatpush3.msra.mxu0 %v90_v4 }
 0x280   :  { %757 = vmatprep.subr.mxu0 %v818_v0 }
 0x281   :  { %758 = vmatpush3.msra.mxu0 %v89_v5 }
 0x282   :  { %759 = vmatprep.subr.mxu0 %v818_v0 }
 0x283   :  { %760 = vmatpush3.msra.mxu0 %v88_v6 }
 0x284   :  { %761 = vmatprep.subr.mxu0 %v818_v0 }
 0x285   :  { %762 = vmatpush3.msra.mxu0 %v87_v7 }
 0x286   :  { %763 = vmatprep.subr.mxu0 %v818_v0 }
 0x287   :  { %764 = vmatpush3.msra.mxu0 %v86_v8 }
 0x288   :  { %765 = vmatprep.subr.mxu0 %v818_v0 }
 0x289   :  { %766 = vmatpush3.msra.mxu0 %v85_v9 }
 0x28a   :  { %767 = vmatprep.subr.mxu0 %v818_v0 }
 0x28b   :  { %768 = vmatpush3.msra.mxu0 %v84_v10 }
 0x28c   :  { %769 = vmatprep.subr.mxu0 %v818_v0 }
 0x28d   :  { %770 = vmatpush3.msra.mxu0 %v83_v11 }
 0x28e   :  { %771 = vmatprep.subr.mxu0 %v818_v0 }
 0x28f   :  { %772 = vmatpush3.msra.mxu0 %v82_v12 }
 0x290   :  { %773 = vmatprep.subr.mxu0 %v818_v0 }
 0x291   :  { %774 = vmatpush3.msra.mxu0 %v81_v13 }
 0x292   :  { %775 = vmatprep.subr.mxu0 %v818_v0 }
 0x293   :  { %776 = vmatpush3.msra.mxu0 %v80_v20 }
 0x294   :  { %777 = vmatprep.subr.mxu0 %v818_v0 }
 0x295   :  { %778 = vmatpush3.msra.mxu0 %v79_v21 }
 0x296   :  { %779 = vmatprep.subr.mxu0 %v818_v0 }
 0x297   :  { %780 = vmatpush3.msra.mxu0 %v78_v22 }
 0x338   :  { %v384_v16 = vpop.f32.mrf.mxu0 }
 0x339   :  { %v385_v17 = vadd.f32 %v384_v16, %v317_v15 }
 0x33a   :  { %v713_v18 = vpop.f32.mrf.mxu0 }
 0x33b   :  { %v388_v19 = vmax.f32 %v385_v17, 0.0 }
 0x33d   :  { %747 = vmatmul.mubr.f32.vlgmr.msra.gmra.mxu1 %v388_v19 }
 0x3fd   :  { %v459_v25 = vpop.f32.mrf.mxu1 }
 0x3fe   :  { %v460_v26 = vadd.f32 %v459_v25, %v392_v24 }
 0x3ff   :  { %v748_v27 = vpop.f32.mrf.mxu1 }
 0x400   :  { %v463_v28 = vmax.f32 %v460_v26, 0.0 }
 0x402   :  { %782 = vmatmul.mubr.f32.vlgmr.msra.gmra.mxu0 %v463_v28 }
 0x4c2   :  { %v534_v32 = vpop.f32.mrf.mxu0 }
 0x4c3   :  { %v535_v0 = vadd.f32 %v534_v32, %v467_v31 }
 0x4c4   :  { %v783_v33 = vpop.f32.mrf.mxu0 }
 0x4c5   :  { %v541_v34 = vsel %vm540_vm2, %v535_v0, -inf }
 0x4c6   :  { %542 = vmax.xlane.f32.xlu0 %v541_v34 }
 0x54f   :  { %v543_v35 = vpop.xlane.xlu0 %542 }
 0x550   :  { %v544_v36 = vsub.f32 %v535_v0, %v543_v35 }
 0x552   :  { %v545_v39 = vmul.f32 1.442695, %v544_v36 }
 0x554   :  { %789 = vpow2.f32 %v545_v39 }
 0x561   :  { %v790_v41 = vpop.eup %789 }
 0x562   :  { %v547_v42 = vsel %vm540_vm2, %v790_v41, 0.0 }
 0x563   :  { %548 = vadd.xlane.f32.xlu0 %v547_v42 }
 0x5ec   :  { %v549_v43 = vpop.xlane.xlu0 %548 }
 0x5ed   :  { %791 = vrcp.f32 %v549_v43 }
 0x5fa   :  { %v792_v38 = vpop.eup %791 }
 0x5fb   :  { %v551_v37 = vmul.f32 %v792_v38, %v547_v42 }
 0x5fd   :  { %v553_v44 = vsel %vm552_vm3, %v535_v0, %v551_v37 }
 0x5fe   :  { %554 = vst [vmem:[%s953_s3] sm:$0xff] %v553_v44 }
 0x5ff   :  { %559 = vsyncpa [#allocation3], 1 }

</bundles_post_ra>
